<compile_context>
chip_gen: v5e
topology: v5e:2x2
jax: 0.10.0
libtpu: 0.0.40
codegen_flags: <defaults>
</compile_context>

<pallas_src>
import jax
import jax.numpy as jnp
from jax.experimental import pallas as pl
from jax.experimental.pallas import tpu as pltpu


def _round_up(x, m):
    return ((x + m - 1) // m) * m


def _default_batch_block(B):
    """v7x has 2 TensorCores/chip -> give each a grid step; v5e/v6e are 1-TC,
    so a single-step grid avoids the ~0.35 us per-step pipeline overhead."""
    try:
        kind = jax.devices()[0].device_kind.lower()
    except Exception:
        kind = ""
    if "v7" in kind and B >= 2 and B % 2 == 0:
        return B // 2
    return B


def _block_diag_adj(adj, TB):
    """(B, N, N) -> (B//TB, TB*N, TB*N) block-diagonal slabs (wrapper-side)."""
    B, N, _ = adj.shape
    G = B // TB
    adj = adj.reshape(G, TB, N, N)
    eye = jnp.eye(TB, dtype=adj.dtype)
    # bd[g, b, i, b', j] = adj[g, b, i, j] if b == b' else 0
    bd = adj[:, :, :, None, :] * eye[None, :, None, :, None]
    return bd.reshape(G, TB * N, TB * N)


def gcn_kernel(x_ref, adj_ref, w1_ref, b1_ref, w2_ref, b2_ref, out_ref):
    """One fused batch slab per grid step.

    x_ref   : (M, Fin)      with M = TB*N (fused batch rows)
    adj_ref : (1, M, M)     block-diagonal adjacency slab
    w1_ref  : (Fin, H),     b1_ref : (1, H)
    w2_ref  : (H, Fpad),    b2_ref : (1, Fpad)   (lane-padded to 128)
    out_ref : (M, Fpad)
    """
    adj = adj_ref[0]                                           # (M, M)

    # Row-normalize the adjacency once; (adj @ Y) / deg == (adj / deg) @ Y.
    # deg == 0 (isolated node, no self-loop): reference would produce nan/inf;
    # here the row stays all-zero and the layer outputs its bias.
    deg = jnp.sum(adj, axis=-1, keepdims=True)                 # (M, 1)
    safe_deg = jnp.where(deg == 0.0, 1.0, deg)
    adj_n = adj * pl.reciprocal(safe_deg, approx=False)        # (M, M)

    # ---- layer 1: linear -> aggregate -> relu (exact reference math) -------
    h = jnp.dot(x_ref[...], w1_ref[...],
                preferred_element_type=jnp.float32) + b1_ref[...]
    h = jnp.dot(adj_n, h, preferred_element_type=jnp.float32)  # (M, H)
    h = jnp.maximum(h, 0.0)

    # ---- layer 2: aggregate at width H, then lane-dense linear -------------
    # adj_n @ (h W2 + b2) == (adj_n @ h) @ W2 + b2  since rowsum(adj_n) == 1
    # whenever deg > 0 (for deg == 0 the output is b2; see note above).
    h = jnp.dot(adj_n, h, preferred_element_type=jnp.float32)  # (M, H)
    out = jnp.dot(h, w2_ref[...],
                  preferred_element_type=jnp.float32) + b2_ref[...]

    out_ref[...] = out.astype(out_ref.dtype)


def gcn_forward(node_features, adj_matrix, w1, b1, w2, b2, *, batch_block=None):
    B, N, Fin = node_features.shape
    H = w1.shape[1]
    Fout = w2.shape[1]

    if batch_block is None:
        batch_block = _default_batch_block(B)
    assert B % batch_block == 0, "batch_block must divide B"
    TB = batch_block
    G = B // TB
    M = TB * N

    # Lane-dense output: pad the last linear layer's output dim to 128 so the
    # kernel's stores are unmasked; slice the padding back off afterwards.
    Fpad = _round_up(Fout, 128)
    w2p = jnp.pad(w2, ((0, 0), (0, Fpad - Fout)))
    b2p = jnp.pad(b2, ((0, 0), (0, Fpad - Fout)))

    # Wrapper-side layout plumbing (free): fused 2-D node slab + block-diag adj.
    x2d = node_features.reshape(B * N, Fin)
    adj_bd = _block_diag_adj(adj_matrix, TB)                   # (G, M, M)

    # TODO(synk): for large N, drop the block-diag trick, tile the neighbor
    # (reduction) axis of adj over a trailing "arbitrary" grid axis with a
    # VMEM accumulator, and re-derive tile sizes per generation (v7x has only
    # 64 MiB physical VMEM, half of v5e/v6e) with an explicit vmem_limit_bytes.
    # Loop-invariant weight specs could also use pipeline_mode=pl.Buffered(1);
    # skipped here since the grid is 1-2 steps and H/Fpad are tiny.
    out2d = pl.pallas_call(
        gcn_kernel,
        out_shape=jax.ShapeDtypeStruct((B * N, Fpad), node_features.dtype),
        grid_spec=pltpu.PrefetchScalarGridSpec(
            num_scalar_prefetch=0,
            grid=(G,),
            in_specs=[
                pl.BlockSpec((M, Fin), lambda b: (b, 0)),
                pl.BlockSpec((1, M, M), lambda b: (b, 0, 0)),
                pl.BlockSpec((Fin, H), lambda b: (0, 0)),
                pl.BlockSpec((1, H), lambda b: (0, 0)),
                pl.BlockSpec((H, Fpad), lambda b: (0, 0)),
                pl.BlockSpec((1, Fpad), lambda b: (0, 0)),
            ],
            out_specs=pl.BlockSpec((M, Fpad), lambda b: (b, 0)),
        ),
        compiler_params=pltpu.CompilerParams(
            dimension_semantics=("parallel",)),
    )(x2d, adj_bd, w1, b1, w2p, b2p)

    return out2d[:, :Fout].reshape(B, N, Fout)


def gcn_reference(node_features, adj_matrix, w1, b1, w2, b2):
    """Pure-JAX reference mirroring the PyTorch module exactly."""
    deg = jnp.sum(adj_matrix, axis=-1, keepdims=True)          # (B, N, 1)

    h = node_features @ w1 + b1                                 # linear
    h = jnp.einsum('bij,bjk->bik', adj_matrix, h)               # bmm
    h = h / deg
    h = jax.nn.relu(h)

    h = h @ w2 + b2
    h = jnp.einsum('bij,bjk->bik', adj_matrix, h)
    h = h / deg
    return h


if __name__ == "__main__":
    # Small shapes consistent with the module's forward.
    B, N = 8, 8            # batch, num nodes
    Fin, Hid, Fout = 16, 32, 8

    key = jax.random.PRNGKey(0)
    k_x, k_adj, k_w1, k_b1, k_w2, k_b2 = jax.random.split(key, 6)

    node_features = jax.random.normal(k_x, (B, N, Fin), dtype=jnp.float32)

    # Binary adjacency with self-loops so every node has >= 1 neighbour
    # (matches the reference's well-defined domain: deg > 0 everywhere).
    adj = (jax.random.uniform(k_adj, (B, N, N)) < 0.4).astype(jnp.float32)
    adj = jnp.maximum(adj, jnp.eye(N, dtype=jnp.float32)[None, :, :])

    # Deterministic parameter init (fan-in scaled), stored as (in, out).
    w1 = jax.random.normal(k_w1, (Fin, Hid), dtype=jnp.float32) / jnp.sqrt(Fin)
    b1 = jax.random.normal(k_b1, (1, Hid), dtype=jnp.float32) * 0.01
    w2 = jax.random.normal(k_w2, (Hid, Fout), dtype=jnp.float32) / jnp.sqrt(Hid)
    b2 = jax.random.normal(k_b2, (1, Fout), dtype=jnp.float32) * 0.01

    out = gcn_forward(node_features, adj, w1, b1, w2, b2)
    out = jax.block_until_ready(out)

    ref = gcn_reference(node_features, adj, w1, b1, w2, b2)
    assert out.shape == (B, N, Fout)
    # Algebraically identical to the reference; tolerance covers fp-rounding
    # from the normalize-before-aggregate ordering and the layer-2 bias fold.
    assert jnp.allclose(out, ref, atol=1e-4, rtol=1e-4), "mismatch vs reference"

    print("KERNEL_OK")
</pallas_src>

<mosaic_0001>
module attributes {stable_mosaic.version = 11 : i64} {
  func.func @gcn_kernel(%arg0: i32, %arg1: memref<64x16xf32, #tpu.memory_space<vmem>>, %arg2: memref<1x64x64xf32, #tpu.memory_space<vmem>>, %arg3: memref<16x32xf32, #tpu.memory_space<vmem>>, %arg4: memref<1x32xf32, #tpu.memory_space<vmem>>, %arg5: memref<32x128xf32, #tpu.memory_space<vmem>>, %arg6: memref<1x128xf32, #tpu.memory_space<vmem>>, %arg7: memref<64x128xf32, #tpu.memory_space<vmem>>) attributes {dimension_semantics = [#tpu.dimension_semantics<parallel>], iteration_bounds = array<i64: 1>, scalar_prefetch = 0 : i64, scratch_operands = 0 : i64, tpu.core_type = #tpu.core_type<tc>, window_params = [{transform_indices = @transform_0, window_bounds = array<i64: 64, 16>}, {transform_indices = @transform_1, window_bounds = array<i64: 1, 64, 64>}, {pipeline_mode = #tpu.pipeline_mode<synchronous>, transform_indices = @transform_2, window_bounds = array<i64: 16, 32>}, {pipeline_mode = #tpu.pipeline_mode<synchronous>, transform_indices = @transform_3, window_bounds = array<i64: 1, 32>}, {pipeline_mode = #tpu.pipeline_mode<synchronous>, transform_indices = @transform_4, window_bounds = array<i64: 32, 128>}, {pipeline_mode = #tpu.pipeline_mode<synchronous>, transform_indices = @transform_5, window_bounds = array<i64: 1, 128>}, {transform_indices = @transform_6, window_bounds = array<i64: 64, 128>}]} {
    %c0 = arith.constant 0 : index
    %c0_0 = arith.constant 0 : index
    %c0_1 = arith.constant 0 : index
    %0 = vector.load %arg2[%c0, %c0_0, %c0_1] : memref<1x64x64xf32, #tpu.memory_space<vmem>>, vector<1x64x64xf32>
    %1 = vector.shape_cast %0 : vector<1x64x64xf32> to vector<64x64xf32>
    %cst = arith.constant dense<0.000000e+00> : vector<64xf32>
    %2 = vector.multi_reduction <add>, %1, %cst [1] : vector<64x64xf32> to vector<64xf32>
    %3 = vector.shape_cast %2 : vector<64xf32> to vector<64x1xf32>
    %cst_2 = arith.constant 0.000000e+00 : f32
    %4 = vector.broadcast %cst_2 : f32 to vector<64x1xf32>
    %5 = arith.cmpf oeq, %3, %4 : vector<64x1xf32>
    %cst_3 = arith.constant 1.000000e+00 : f32
    %6 = vector.broadcast %cst_3 : f32 to vector<64x1xf32>
    %7 = arith.select %5, %6, %3 : vector<64x1xi1>, vector<64x1xf32>
    %8 = tpu.reciprocal %7 : vector<64x1xf32> -> vector<64x1xf32>
    %9 = vector.broadcast %8 : vector<64x1xf32> to vector<64x64xf32>
    %10 = arith.mulf %1, %9 : vector<64x64xf32>
    %c0_4 = arith.constant 0 : index
    %c0_5 = arith.constant 0 : index
    %11 = vector.load %arg1[%c0_4, %c0_5] : memref<64x16xf32, #tpu.memory_space<vmem>>, vector<64x16xf32>
    %c0_6 = arith.constant 0 : index
    %c0_7 = arith.constant 0 : index
    %12 = vector.load %arg3[%c0_6, %c0_7] : memref<16x32xf32, #tpu.memory_space<vmem>>, vector<16x32xf32>
    %cst_8 = arith.constant dense<0.000000e+00> : vector<64x32xf32>
    %13 = tpu.matmul %11, %12, %cst_8 {dimension_numbers = #tpu.dot_dimension_numbers<[1], [0], [0], [1], [0, 0, 1, 1], [], []>} : vector<64x16xf32>, vector<16x32xf32>, vector<64x32xf32> -> vector<64x32xf32>
    %c0_9 = arith.constant 0 : index
    %c0_10 = arith.constant 0 : index
    %14 = vector.load %arg4[%c0_9, %c0_10] : memref<1x32xf32, #tpu.memory_space<vmem>>, vector<1x32xf32>
    %15 = vector.broadcast %14 : vector<1x32xf32> to vector<64x32xf32>
    %16 = arith.addf %13, %15 : vector<64x32xf32>
    %cst_11 = arith.constant dense<0.000000e+00> : vector<64x32xf32>
    %17 = tpu.matmul %10, %16, %cst_11 {dimension_numbers = #tpu.dot_dimension_numbers<[1], [0], [0], [1], [0, 0, 1, 1], [], []>} : vector<64x64xf32>, vector<64x32xf32>, vector<64x32xf32> -> vector<64x32xf32>
    %cst_12 = arith.constant 0.000000e+00 : f32
    %18 = vector.broadcast %cst_12 : f32 to vector<64x32xf32>
    %19 = arith.maximumf %17, %18 : vector<64x32xf32>
    %cst_13 = arith.constant dense<0.000000e+00> : vector<64x32xf32>
    %20 = tpu.matmul %10, %19, %cst_13 {dimension_numbers = #tpu.dot_dimension_numbers<[1], [0], [0], [1], [0, 0, 1, 1], [], []>} : vector<64x64xf32>, vector<64x32xf32>, vector<64x32xf32> -> vector<64x32xf32>
    %c0_14 = arith.constant 0 : index
    %c0_15 = arith.constant 0 : index
    %21 = vector.load %arg5[%c0_14, %c0_15] : memref<32x128xf32, #tpu.memory_space<vmem>>, vector<32x128xf32>
    %cst_16 = arith.constant dense<0.000000e+00> : vector<64x128xf32>
    %22 = tpu.matmul %20, %21, %cst_16 {dimension_numbers = #tpu.dot_dimension_numbers<[1], [0], [0], [1], [0, 0, 1, 1], [], []>} : vector<64x32xf32>, vector<32x128xf32>, vector<64x128xf32> -> vector<64x128xf32>
    %c0_17 = arith.constant 0 : index
    %c0_18 = arith.constant 0 : index
    %23 = vector.load %arg6[%c0_17, %c0_18] : memref<1x128xf32, #tpu.memory_space<vmem>>, vector<1x128xf32>
    %24 = vector.broadcast %23 : vector<1x128xf32> to vector<64x128xf32>
    %25 = arith.addf %22, %24 : vector<64x128xf32>
    %c0_19 = arith.constant 0 : index
    %c0_20 = arith.constant 0 : index
    %26 = vector.load %arg7[%c0_19, %c0_20] : memref<64x128xf32, #tpu.memory_space<vmem>>, vector<64x128xf32>
    tpu.vector_store %arg7[%c0_19, %c0_20], %25 {strides = array<i32>} : memref<64x128xf32, #tpu.memory_space<vmem>>, vector<64x128xf32>,
    return
  }
  func.func @transform_0(%arg0: i32) -> (i32, i32) {
    %c0_i32 = arith.constant 0 : i32
    %c0_i32_0 = arith.constant 0 : i32
    return %arg0, %c0_i32 : i32, i32
  }
  func.func @transform_1(%arg0: i32) -> (i32, i32, i32) {
    %c0_i32 = arith.constant 0 : i32
    %c0_i32_0 = arith.constant 0 : i32
    %c0_i32_1 = arith.constant 0 : i32
    return %arg0, %c0_i32, %c0_i32_0 : i32, i32, i32
  }
  func.func @transform_2(%arg0: i32) -> (i32, i32) {
    %c0_i32 = arith.constant 0 : i32
    %c0_i32_0 = arith.constant 0 : i32
    %c0_i32_1 = arith.constant 0 : i32
    return %c0_i32, %c0_i32_0 : i32, i32
  }
  func.func @transform_3(%arg0: i32) -> (i32, i32) {
    %c0_i32 = arith.constant 0 : i32
    %c0_i32_0 = arith.constant 0 : i32
    %c0_i32_1 = arith.constant 0 : i32
    return %c0_i32, %c0_i32_0 : i32, i32
  }
  func.func @transform_4(%arg0: i32) -> (i32, i32) {
    %c0_i32 = arith.constant 0 : i32
    %c0_i32_0 = arith.constant 0 : i32
    %c0_i32_1 = arith.constant 0 : i32
    return %c0_i32, %c0_i32_0 : i32, i32
  }
  func.func @transform_5(%arg0: i32) -> (i32, i32) {
    %c0_i32 = arith.constant 0 : i32
    %c0_i32_0 = arith.constant 0 : i32
    %c0_i32_1 = arith.constant 0 : i32
    return %c0_i32, %c0_i32_0 : i32, i32
  }
  func.func @transform_6(%arg0: i32) -> (i32, i32) {
    %c0_i32 = arith.constant 0 : i32
    %c0_i32_0 = arith.constant 0 : i32
    return %arg0, %c0_i32 : i32, i32
  }
}

</mosaic_0001>

<bundles_post_ra>
// kernel: tpu_custom_call.1
= control target key start
LH: loop header
LB: loop body
LE: loop exit
PB: predicated region body
PF: predicated region fallthrough
CT: control target
= control target key end

     0   :  { %11 = vsyncpa [#allocation3], 0  ;;  %s884_s0 = inlined_call_operand.vmem [shape: f32[64,16], index: 0, kind: input, shape index: {}]   ;;  %s885_s1 = inlined_call_operand.vmem [shape: f32[1,64,64], index: 1, kind: input, shape index: {}]   ;;  %s886_s2 = inlined_call_operand.vmem [shape: f32[16,32], index: 2, kind: input, shape index: {}]   ;;  %s887_s3 = inlined_call_operand.vmem [shape: f32[1,32], index: 3, kind: input, shape index: {}]   ;;  %s888_s4 = inlined_call_operand.hbm [shape: f32[32,128], index: 4, kind: input, shape index: {}]   ;;  %s889_s5 = inlined_call_operand.vmem [shape: f32[1,128], index: 5, kind: input, shape index: {}]   ;;  %s890_s6 = inlined_call_operand.hbm [shape: f32[64,128], index: 6, kind: output, shape index: {}]  }
   0x1   :  { %12 = vsyncpa [#allocation4], 0  ;;  %s25_s23 = sshll.u32 %s888_s4, 4  ;;  %s610_s24 = smov [#allocation2]   ;;  %s26_s23 = int_to_ptr.hbm [resolvable:$true] %s25_s23 }
   0x2   :  { %s27_s25 = sshll.u32 %s610_s24, 4  ;;  %s611_s26 = smov 128   ;;  %s28_s25 = int_to_ptr.vmem [resolvable:$true] %s27_s25 }
   0x3   :  { %s612_s27 = smov 8  }
   0x4   :  { %33 = dma.hbm_to_vmem [thread:$0]  %s26_s23, 512, %s28_s25, [#allocation3], %s611_s26, %s611_s26, %s612_s27  }
   0x5   :  { %606 = dma.done.wait [#allocation3], 512  }
   0x6   :  { %607 = vsyncadd [#allocation3], 4294966784  ;;  %v218_v0 = vld [vmem:[%s886_s2 + $0x8] sm:$0xff]  ;;  %v217_v1 = vld [vmem:[%s886_s2] sm:$0xff]  ;;  %vm223_vm0 = vcmask 130048   ;;  %vm48_vm1 = vcmask 523264  }
   0x7   :  { %262 = vmatpush.msra.mxu0 %v218_v0  ;;  %v209_v2 = vld [vmem:[%s884_s0] sm:$0xff]  ;;  %v210_v3 = vld [vmem:[%s884_s0 + $0x8] sm:$0xff]  ;;  %v211_v4 = vld [vmem:[%s884_s0 + $0x10] sm:$0xff]  ;;  %s491_s18 = sshll.u32 %s890_s6, 4  ;;  %s492_s18 = int_to_ptr.hbm [resolvable:$true] %s491_s18 }
   0x8   :  { %v675_v5 = vld [vmem:[%s885_s1] sm:$0xff]  ;;  %v212_v7 = vld [vmem:[%s884_s0 + $0x18] sm:$0xff]  ;;  %v686_v8 = vld [vmem:[%s885_s1 + $0x8] sm:$0xff] }
   0x9   :  { %263 = vmatpush.msra.mxu0 %v217_v1  ;;  %v49_v6 = vsel %vm48_vm1, %v675_v5, 0.0  ;;  %v52_v9 = vsel %vm48_vm1, %v686_v8, 0.0  ;;  %v694_v10 = vld [vmem:[%s885_s1 + $0x10] sm:$0xff]  ;;  %v699_v11 = vld [vmem:[%s885_s1 + $0x20] sm:$0xff]  ;;  %v713_v15 = vld [vmem:[%s885_s1 + $0x18] sm:$0xff] }
   0xa   :  { %504 = vmatmul.msk.f32.vlgmr.msra.gmra.mxu0 %vm223_vm0, %v209_v2  ;;  %50 = vadd.xlane.f32.xlu0 %v49_v6  ;;  %v55_v12 = vsel %vm48_vm1, %v694_v10, 0.0  ;;  %v61_v13 = vsel %vm48_vm1, %v699_v11, 0.0  ;;  %v708_v14 = vld [vmem:[%s885_s1 + $0x30] sm:$0xff]  ;;  %v718_v16 = vld [vmem:[%s885_s1 + $0x28] sm:$0xff]  ;;  %v213_v17 = vld [vmem:[%s884_s0 + $0x20] sm:$0xff]  ;;  %v58_v19 = vsel %vm48_vm1, %v713_v15, 0.0 }
   0xb   :  { %56 = vadd.xlane.f32.xlu1 %v55_v12  ;;  %62 = vadd.xlane.f32.xlu2 %v61_v13  ;;  %v67_v18 = vsel %vm48_vm1, %v708_v14, 0.0  ;;  %v64_v20 = vsel %vm48_vm1, %v718_v16, 0.0  ;;  %v733_v21 = vld [vmem:[%s885_s1 + $0x38] sm:$0xff]  ;;  %v214_v22 = vld [vmem:[%s884_s0 + $0x28] sm:$0xff]  ;;  %v215_v24 = vld [vmem:[%s884_s0 + $0x30] sm:$0xff] }
   0xc   :  { %v70_v23 = vsel %vm48_vm1, %v733_v21, 0.0  ;;  %v216_v25 = vld [vmem:[%s884_s0 + $0x38] sm:$0xff]  ;;  %v540_v43 = vld [vmem:[%s887_s3] ss:$0 sm:$0xff] }
  0x12   :  { %505 = vmatmul.msk.f32.gmra.mxu0 %vm223_vm0, %v210_v3  ;;  %53 = vadd.xlane.f32.xlu0 %v52_v9 }
  0x13   :  { %59 = vadd.xlane.f32.xlu1 %v58_v19  ;;  %65 = vadd.xlane.f32.xlu2 %v64_v20 }
  0x1a   :  { %506 = vmatmul.msk.f32.gmra.mxu0 %vm223_vm0, %v211_v4  ;;  %68 = vadd.xlane.f32.xlu0 %v67_v18 }
  0x1b   :  { %71 = vadd.xlane.f32.xlu1 %v70_v23 }
  0x22   :  { %507 = vmatmul.msk.f32.gmra.mxu0 %vm223_vm0, %v212_v7 }
  0x2a   :  { %508 = vmatmul.msk.f32.gmra.mxu0 %vm223_vm0, %v213_v17 }
  0x32   :  { %509 = vmatmul.msk.f32.gmra.mxu0 %vm223_vm0, %v214_v22 }
  0x3a   :  { %510 = vmatmul.msk.f32.gmra.mxu0 %vm223_vm0, %v215_v24 }
  0x42   :  { %511 = vmatmul.msk.f32.gmra.mxu0 %vm223_vm0, %v216_v25 }
  0x7d   :  { %v51_v30 = vpop.xlane.xlu0 %50 }
  0x7e   :  { %vm73_vm2 = vcmp.eq.f32.partialorder %v51_v30, 0.0  ;;  %v57_v36 = vpop.xlane.xlu1 %56  ;;  %v63_v54 = vpop.xlane.xlu2 %62 }
  0x7f   :  { %v81_v32 = vsel %vm73_vm2, 1.0, %v51_v30  ;;  %vm75_vm4 = vcmp.eq.f32.partialorder %v57_v36, 0.0  ;;  %vm77_vm10 = vcmp.eq.f32.partialorder %v63_v54, 0.0 }
  0x80   :  { %542 = vrcp.f32 %v81_v32  ;;  %v754_v41 = vsel %vm75_vm4, 1.0, %v57_v36  ;;  %vm94_vm6 = vweird.f32 %v81_v32  ;;  %v100_v50 = vand.u32 2147483648, %v81_v32 }
  0x81   :  { %v98_v56 = vand.u32 2147483647, %v81_v32  ;;  %v781_v7 = vsel %vm77_vm10, 1.0, %v63_v54  ;;  %vm122_vm0 = vweird.f32 %v754_v41  ;;  %v126_v30 = vand.u32 2147483647, %v754_v41 }
  0x82   :  { %v101_v61 = vor.u32 1.1754944e-38, %v100_v50  ;;  %v156_v50 = vand.u32 2147483648, %v781_v7  ;;  %v154_v54 = vand.u32 2147483647, %v781_v7 }
  0x83   :  { %vm99_vm9 = vcmp.eq.f32.partialorder %v98_v56, 8.507059e+37  ;;  %vm127_vm4 = vcmp.eq.f32.partialorder %v126_v30, 8.507059e+37 }
  0x85   :  { %v54_v34 = vpop.xlane.xlu0 %53 }
  0x86   :  { %vm74_vm3 = vcmp.eq.f32.partialorder %v54_v34, 0.0  ;;  %v543_v37 = vpop.eup %542  ;;  %v60_v45 = vpop.xlane.xlu1 %59 }
  0x87   :  { %v749_v26 = vpop.f32.mrf.mxu0  ;;  %v751_v35 = vsel %vm74_vm3, 1.0, %v54_v34  ;;  %v90_v39 = vmul.f32 %v543_v37, %v81_v32  ;;  %vm76_vm5 = vcmp.eq.f32.partialorder %v60_v45, 0.0  ;;  %vm95_vm7 = vweird.f32 %v543_v37  ;;  %v66_v20 = vpop.xlane.xlu2 %65 }
  0x88   :  { %544 = vrcp.f32 %v751_v35  ;;  %v764_v53 = vsel %vm76_vm5, 1.0, %v60_v45  ;;  %vm768_vm8 = vmor %vm94_vm6, %vm95_vm7  ;;  %vm108_vm11 = vweird.f32 %v751_v35  ;;  %v114_v3 = vand.u32 2147483648, %v751_v35 }
  0x89   :  { %v91_v40 = vsub.f32 1.0, %v90_v39  ;;  %546 = vrcp.f32 %v754_v41  ;;  %v112_v12 = vand.u32 2147483647, %v751_v35  ;;  %v266_v17 = vadd.f32 %v540_v43, %v749_v26 }
  0x8a   :  { %548 = vrcp.f32 %v764_v53  ;;  %v115_v22 = vor.u32 1.1754944e-38, %v114_v3  ;;  %vm78_vm15 = vcmp.eq.f32.partialorder %v66_v20, 0.0  ;;  %vm136_vm6 = vweird.f32 %v764_v53 }
  0x8b   :  { %v92_v47 = vmul.f32 %v543_v37, %v91_v40  ;;  %550 = vrcp.f32 %v781_v7  ;;  %vm113_vm14 = vcmp.eq.f32.partialorder %v112_v12, 8.507059e+37 }
  0x8d   :  { %v93_v55 = vadd.f32 %v543_v37, %v92_v47 }
  0x8e   :  { %v756_v42 = vpop.eup %544  ;;  %v72_v45 = vpop.xlane.xlu1 %71 }
  0x8f   :  { %v268_v27 = vpop.f32.mrf.mxu0  ;;  %v104_v48 = vmul.f32 %v756_v42, %v751_v35  ;;  %v766_v57 = vpop.eup %546  ;;  %v97_v0 = vsel %vm768_vm8, %v543_v37, %v93_v55  ;;  %vm109_vm12 = vweird.f32 %v756_v42  ;;  %vm80_vm10 = vcmp.eq.f32.partialorder %v72_v45, 0.0 }
  0x90   :  { %v118_v63 = vmul.f32 %v766_v57, %v754_v41  ;;  %v269_v2 = vadd.f32 %v540_v43, %v268_v27  ;;  %v102_v4 = vsel %vm99_vm9, %v101_v61, %v97_v0  ;;  %v549_v13 = vpop.eup %548  ;;  %vm786_vm13 = vmor %vm108_vm11, %vm109_vm12  ;;  %vm123_vm2 = vweird.f32 %v766_v57 }
  0x91   :  { %v105_v52 = vsub.f32 1.0, %v104_v48  ;;  %v791_v19 = vmul.f32 %v102_v4, %v675_v5  ;;  %v132_v24 = vmul.f32 %v549_v13, %v764_v53  ;;  %v128_v5 = vand.u32 2147483648, %v754_v41  ;;  %vm124_vm3 = vmor %vm122_vm0, %vm123_vm2 }
  0x92   :  { %v119_v6 = vsub.f32 1.0, %v118_v63  ;;  %vm137_vm7 = vweird.f32 %v549_v13  ;;  %vm150_vm11 = vweird.f32 %v781_v7 }
  0x93   :  { %v106_v62 = vmul.f32 %v756_v42, %v105_v52  ;;  %v133_v27 = vsub.f32 1.0, %v132_v24  ;;  %v129_v34 = vor.u32 1.1754944e-38, %v128_v5  ;;  %vm138_vm8 = vmor %vm136_vm6, %vm137_vm7  ;;  %v88_v52 = vsel %vm80_vm10, 1.0, %v72_v45 }
  0x94   :  { %v120_v23 = vmul.f32 %v766_v57, %v119_v6  ;;  %v198_v24 = vand.u32 2147483648, %v88_v52 }
  0x95   :  { %v107_v9 = vadd.f32 %v756_v42, %v106_v62  ;;  %v134_v35 = vmul.f32 %v549_v13, %v133_v27 }
  0x97   :  { %v271_v28 = vpop.f32.mrf.mxu0  ;;  %v111_v25 = vsel %vm786_vm13, %v756_v42, %v107_v9  ;;  %v135_v41 = vadd.f32 %v549_v13, %v134_v35  ;;  %v140_v42 = vand.u32 2147483647, %v764_v53 }
  0x98   :  { %v272_v1 = vadd.f32 %v540_v43, %v271_v28  ;;  %v116_v26 = vsel %vm113_vm14, %v115_v22, %v111_v25  ;;  %v804_v28 = vsel %vm78_vm15, 1.0, %v66_v20  ;;  %vm155_vm14 = vcmp.eq.f32.partialorder %v154_v54, 8.507059e+37  ;;  %v541_v54 = vld [vmem:[%s889_s5] ss:$0 sm:$0xff]  ;;  %s613_s5 = smov [#allocation5]  }
  0x99   :  { %v809_v32 = vmul.f32 %v116_v26, %v686_v8  ;;  %552 = vrcp.f32 %v804_v28  ;;  %v142_v8 = vand.u32 2147483648, %v764_v53  ;;  %vm141_vm9 = vcmp.eq.f32.partialorder %v140_v42, 8.507059e+37  ;;  %s489_s15 = sshll.u32 %s613_s5, 4  ;;  %s490_s15 = int_to_ptr.vmem [resolvable:$true] %s489_s15 }
  0x9a   :  { %vm164_vm15 = vweird.f32 %v804_v28  ;;  %v170_v61 = vand.u32 2147483648, %v804_v28  ;;  %v196_v26 = vand.u32 2147483647, %v88_v52 }
  0x9c   :  { %v171_v3 = vor.u32 1.1754944e-38, %v170_v61 }
  0x9f   :  { %v274_v29 = vpop.f32.mrf.mxu0 }
  0xa0   :  { %v275_v60 = vadd.f32 %v540_v43, %v274_v29  ;;  %v121_v29 = vadd.f32 %v766_v57, %v120_v23 }
  0xa2   :  { %v125_v37 = vsel %vm124_vm3, %v766_v57, %v121_v29  ;;  %v157_v57 = vor.u32 1.1754944e-38, %v156_v50 }
  0xa7   :  { %v277_v31 = vpop.f32.mrf.mxu0 }
  0xa8   :  { %v278_v58 = vadd.f32 %v540_v43, %v277_v31  ;;  %v551_v31 = vpop.eup %550 }
  0xa9   :  { %v146_v36 = vmul.f32 %v551_v31, %v781_v7  ;;  %vm151_vm12 = vweird.f32 %v551_v31 }
  0xaa   :  { %vm152_vm13 = vmor %vm150_vm11, %vm151_vm12  ;;  %vm197_vm11 = vcmp.eq.f32.partialorder %v196_v26, 8.507059e+37  ;;  %vm411_vm12 = vcmask 261120  }
  0xab   :  { %v147_v39 = vsub.f32 1.0, %v146_v36 }
  0xad   :  { %v148_v47 = vmul.f32 %v551_v31, %v147_v39 }
  0xaf   :  { %v280_v33 = vpop.f32.mrf.mxu0  ;;  %v149_v53 = vadd.f32 %v551_v31, %v148_v47  ;;  %v405_v47 = vld [vmem:[#allocation2 + $0x10] sm:$0xff] }
  0xb0   :  { %v281_v51 = vadd.f32 %v540_v43, %v280_v33  ;;  %v69_v33 = vpop.xlane.xlu0 %68 }
  0xb1   :  { %vm79_vm5 = vcmp.eq.f32.partialorder %v69_v33, 0.0 }
  0xb2   :  { %v818_v40 = vsel %vm79_vm5, 1.0, %v69_v33 }
  0xb3   :  { %554 = vrcp.f32 %v818_v40  ;;  %v184_v9 = vand.u32 2147483648, %v818_v40 }
  0xb4   :  { %556 = vrcp.f32 %v88_v52 }
  0xb5   :  { %v185_v20 = vor.u32 1.1754944e-38, %v184_v9 }
  0xb7   :  { %v283_v38 = vpop.f32.mrf.mxu0 }
  0xb8   :  { %v284_v49 = vadd.f32 %v540_v43, %v283_v38  ;;  %v130_v38 = vsel %vm127_vm4, %v129_v34, %v125_v37  ;;  %vm178_vm4 = vweird.f32 %v818_v40 }
  0xbf   :  { %v286_v44 = vpop.f32.mrf.mxu0 }
  0xc0   :  { %v287_v46 = vadd.f32 %v540_v43, %v286_v44  ;;  %v553_v43 = vpop.eup %552  ;;  %v822_v44 = vmul.f32 %v130_v38, %v694_v10 }
  0xc1   :  { %v160_v48 = vmul.f32 %v553_v43, %v804_v28  ;;  %v555_v55 = vpop.eup %554  ;;  %vm165_vm0 = vweird.f32 %v553_v43 }
  0xc2   :  { %321 = vmatpush.msra.mxu1 %v287_v46  ;;  %v143_v46 = vor.u32 1.1754944e-38, %v142_v8  ;;  %v174_v59 = vmul.f32 %v555_v55, %v818_v40  ;;  %vm166_vm2 = vmor %vm164_vm15, %vm165_vm0  ;;  %vm179_vm5 = vweird.f32 %v555_v55 }
  0xc3   :  { %vm180_vm6 = vmor %vm178_vm4, %vm179_vm5 }
  0xc4   :  { %322 = vmatpush.msra.mxu1 %v284_v49  ;;  %v139_v49 = vsel %vm138_vm8, %v549_v13, %v135_v41  ;;  %v175_v0 = vsub.f32 1.0, %v174_v59  ;;  %vm192_vm8 = vweird.f32 %v88_v52 }
  0xc5   :  { %v144_v10 = vsel %vm141_vm9, %v143_v46, %v139_v49  ;;  %v406_v46 = vld [vmem:[#allocation2 + $0x18] sm:$0xff] }
  0xc6   :  { %323 = vmatpush.msra.mxu1 %v281_v51  ;;  %v161_v51 = vsub.f32 1.0, %v160_v48  ;;  %v832_v56 = vmul.f32 %v144_v10, %v713_v15  ;;  %v168_v15 = vand.u32 2147483647, %v804_v28  ;;  %v176_v4 = vmul.f32 %v555_v55, %v175_v0  ;;  %448 = vmatpush.msra.mxu3 %v406_v46  ;;  %v404_v48 = vld [vmem:[#allocation2 + $0x8] sm:$0xff] }
  0xc7   :  { %v199_v28 = vor.u32 1.1754944e-38, %v198_v24 }
  0xc8   :  { %324 = vmatpush.msra.mxu1 %v278_v58  ;;  %v162_v58 = vmul.f32 %v553_v43, %v161_v51  ;;  %vm169_vm3 = vcmp.eq.f32.partialorder %v168_v15, 8.507059e+37  ;;  %v177_v13 = vadd.f32 %v555_v55, %v176_v4  ;;  %449 = vmatpush.msra.mxu3 %v405_v47 }
  0xca   :  { %325 = vmatpush.msra.mxu1 %v275_v60  ;;  %v153_v60 = vsel %vm152_vm13, %v551_v31, %v149_v53  ;;  %v163_v63 = vadd.f32 %v553_v43, %v162_v58  ;;  %v181_v23 = vsel %vm180_vm6, %v555_v55, %v177_v13  ;;  %450 = vmatpush.msra.mxu3 %v404_v48 }
  0xcb   :  { %v158_v62 = vsel %vm155_vm14, %v157_v57, %v153_v60 }
  0xcc   :  { %326 = vmatpush.msra.mxu1 %v272_v1  ;;  %v557_v1 = vpop.eup %556  ;;  %v167_v7 = vsel %vm166_vm2, %v553_v43, %v163_v63 }
  0xcd   :  { %v188_v6 = vmul.f32 %v557_v1, %v88_v52  ;;  %v172_v12 = vsel %vm169_vm3, %v171_v3, %v167_v7  ;;  %vm193_vm9 = vweird.f32 %v557_v1 }
  0xce   :  { %327 = vmatpush.msra.mxu1 %v269_v2  ;;  %v841_v2 = vmul.f32 %v158_v62, %v699_v11  ;;  %v206_v11 = vmul.f32 %v172_v12, %v718_v16  ;;  %vm194_vm10 = vmor %vm192_vm8, %vm193_vm9 }
  0xcf   :  { %v189_v18 = vsub.f32 1.0, %v188_v6 }
  0xd0   :  { %328 = vmatpush.msra.mxu1 %v266_v17  ;;  %v182_v17 = vand.u32 2147483647, %v818_v40 }
  0xd1   :  { %512 = vmatmul.msk.f32.vlgmr.msra.gmra.mxu1 %vm48_vm1, %v791_v19  ;;  %v190_v22 = vmul.f32 %v557_v1, %v189_v18 }
  0xd2   :  { %vm183_vm7 = vcmp.eq.f32.partialorder %v182_v17, 8.507059e+37 }
  0xd3   :  { %v186_v25 = vsel %vm183_vm7, %v185_v20, %v181_v23  ;;  %v191_v5 = vadd.f32 %v557_v1, %v190_v22 }
  0xd4   :  { %v207_v27 = vmul.f32 %v186_v25, %v708_v14 }
  0xd5   :  { %v195_v29 = vsel %vm194_vm10, %v557_v1, %v191_v5 }
  0xd6   :  { %v200_v16 = vsel %vm197_vm11, %v199_v28, %v195_v29 }
  0xd7   :  { %v208_v30 = vmul.f32 %v200_v16, %v733_v21 }
  0xd9   :  { %513 = vmatmul.msk.f32.gmra.mxu1 %vm48_vm1, %v809_v32 }
  0xe1   :  { %514 = vmatmul.msk.f32.gmra.mxu1 %vm48_vm1, %v822_v44 }
  0xe9   :  { %515 = vmatmul.msk.f32.gmra.mxu1 %vm48_vm1, %v832_v56 }
  0xf1   :  { %516 = vmatmul.msk.f32.gmra.mxu1 %vm48_vm1, %v841_v2 }
  0xf9   :  { %517 = vmatmul.msk.f32.gmra.mxu1 %vm48_vm1, %v206_v11 }
 0x101   :  { %518 = vmatmul.msk.f32.gmra.mxu1 %vm48_vm1, %v207_v27 }
 0x109   :  { %519 = vmatmul.msk.f32.gmra.mxu1 %vm48_vm1, %v208_v30 }
 0x14e   :  { %v330_v31 = vpop.f32.mrf.mxu1 }
 0x14f   :  { %v354_v45 = vmax.f32 %v330_v31, 0.0 }
 0x156   :  { %v333_v33 = vpop.f32.mrf.mxu1 }
 0x157   :  { %v355_v43 = vmax.f32 %v333_v33, 0.0 }
 0x15e   :  { %v336_v34 = vpop.f32.mrf.mxu1 }
 0x15f   :  { %v356_v21 = vmax.f32 %v336_v34, 0.0 }
 0x166   :  { %v339_v35 = vpop.f32.mrf.mxu1 }
 0x167   :  { %v357_v42 = vmax.f32 %v339_v35, 0.0 }
 0x16e   :  { %v342_v36 = vpop.f32.mrf.mxu1 }
 0x16f   :  { %v358_v41 = vmax.f32 %v342_v36, 0.0 }
 0x176   :  { %v345_v37 = vpop.f32.mrf.mxu1 }
 0x177   :  { %v359_v40 = vmax.f32 %v345_v37, 0.0 }
 0x17e   :  { %v348_v8 = vpop.f32.mrf.mxu1 }
 0x17f   :  { %v360_v14 = vmax.f32 %v348_v8, 0.0 }
 0x186   :  { %v351_v38 = vpop.f32.mrf.mxu1 }
 0x187   :  { %v361_v39 = vmax.f32 %v351_v38, 0.0 }
 0x189   :  { %370 = vmatpush.msra.mxu2 %v361_v39 }
 0x18b   :  { %371 = vmatpush.msra.mxu2 %v360_v14 }
 0x18d   :  { %372 = vmatpush.msra.mxu2 %v359_v40 }
 0x18f   :  { %373 = vmatpush.msra.mxu2 %v358_v41 }
 0x191   :  { %374 = vmatpush.msra.mxu2 %v357_v42 }
 0x193   :  { %375 = vmatpush.msra.mxu2 %v356_v21 }
 0x195   :  { %376 = vmatpush.msra.mxu2 %v355_v43 }
 0x197   :  { %377 = vmatpush.msra.mxu2 %v354_v45 }
 0x198   :  { %520 = vmatmul.msk.f32.vlgmr.msra.gmra.mxu2 %vm48_vm1, %v791_v19  ;;  %v403_v19 = vld [vmem:[#allocation2] sm:$0xff] }
 0x199   :  { %451 = vmatpush.msra.mxu3 %v403_v19 }
 0x1a0   :  { %521 = vmatmul.msk.f32.gmra.mxu2 %vm48_vm1, %v809_v32 }
 0x1a8   :  { %522 = vmatmul.msk.f32.gmra.mxu2 %vm48_vm1, %v822_v44 }
 0x1b0   :  { %523 = vmatmul.msk.f32.gmra.mxu2 %vm48_vm1, %v832_v56 }
 0x1b8   :  { %524 = vmatmul.msk.f32.gmra.mxu2 %vm48_vm1, %v841_v2 }
 0x1c0   :  { %525 = vmatmul.msk.f32.gmra.mxu2 %vm48_vm1, %v206_v11 }
 0x1c8   :  { %526 = vmatmul.msk.f32.gmra.mxu2 %vm48_vm1, %v207_v27 }
 0x1d0   :  { %527 = vmatmul.msk.f32.gmra.mxu2 %vm48_vm1, %v208_v30 }
 0x21b   :  { %v379_v32 = vpop.f32.mrf.mxu2 }
 0x21c   :  { %528 = vmatmul.msk.f32.vlgmr.msra.gmra.mxu3 %vm411_vm12, %v379_v32 }
 0x223   :  { %v382_v44 = vpop.f32.mrf.mxu2 }
 0x224   :  { %529 = vmatmul.msk.f32.gmra.mxu3 %vm411_vm12, %v382_v44 }
 0x22b   :  { %v385_v49 = vpop.f32.mrf.mxu2 }
 0x22c   :  { %530 = vmatmul.msk.f32.gmra.mxu3 %vm411_vm12, %v385_v49 }
 0x233   :  { %v388_v50 = vpop.f32.mrf.mxu2 }
 0x234   :  { %531 = vmatmul.msk.f32.gmra.mxu3 %vm411_vm12, %v388_v50 }
 0x23b   :  { %v391_v10 = vpop.f32.mrf.mxu2 }
 0x23c   :  { %532 = vmatmul.msk.f32.gmra.mxu3 %vm411_vm12, %v391_v10 }
 0x243   :  { %v394_v51 = vpop.f32.mrf.mxu2 }
 0x244   :  { %533 = vmatmul.msk.f32.gmra.mxu3 %vm411_vm12, %v394_v51 }
 0x24b   :  { %v397_v52 = vpop.f32.mrf.mxu2 }
 0x24c   :  { %534 = vmatmul.msk.f32.gmra.mxu3 %vm411_vm12, %v397_v52 }
 0x253   :  { %v400_v53 = vpop.f32.mrf.mxu2 }
 0x254   :  { %535 = vmatmul.msk.f32.gmra.mxu3 %vm411_vm12, %v400_v53 }
 0x29f   :  { %v453_v55 = vpop.f32.mrf.mxu3 }
 0x2a0   :  { %v454_v56 = vadd.f32 %v541_v54, %v453_v55 }
 0x2a2   :  { %477 = vst [vmem:[#allocation5] sm:$0xff] %v454_v56 }
 0x2a7   :  { %v456_v57 = vpop.f32.mrf.mxu3 }
 0x2a8   :  { %v457_v58 = vadd.f32 %v541_v54, %v456_v57 }
 0x2aa   :  { %478 = vst [vmem:[#allocation5 + $0x8] sm:$0xff] %v457_v58 }
 0x2af   :  { %v459_v59 = vpop.f32.mrf.mxu3 }
 0x2b0   :  { %v460_v60 = vadd.f32 %v541_v54, %v459_v59 }
 0x2b2   :  { %479 = vst [vmem:[#allocation5 + $0x10] sm:$0xff] %v460_v60 }
 0x2b7   :  { %v462_v61 = vpop.f32.mrf.mxu3 }
 0x2b8   :  { %v463_v62 = vadd.f32 %v541_v54, %v462_v61 }
 0x2ba   :  { %480 = vst [vmem:[#allocation5 + $0x18] sm:$0xff] %v463_v62 }
 0x2bf   :  { %v465_v63 = vpop.f32.mrf.mxu3 }
 0x2c0   :  { %v466_v15 = vadd.f32 %v541_v54, %v465_v63 }
 0x2c2   :  { %481 = vst [vmem:[#allocation5 + $0x20] sm:$0xff] %v466_v15 }
 0x2c7   :  { %v468_v0 = vpop.f32.mrf.mxu3 }
 0x2c8   :  { %v469_v1 = vadd.f32 %v541_v54, %v468_v0 }
 0x2ca   :  { %482 = vst [vmem:[#allocation5 + $0x28] sm:$0xff] %v469_v1 }
 0x2cf   :  { %v471_v2 = vpop.f32.mrf.mxu3 }
 0x2d0   :  { %v472_v3 = vadd.f32 %v541_v54, %v471_v2 }
 0x2d2   :  { %483 = vst [vmem:[#allocation5 + $0x30] sm:$0xff] %v472_v3 }
 0x2d7   :  { %v474_v4 = vpop.f32.mrf.mxu3 }
 0x2d8   :  { %v475_v6 = vadd.f32 %v541_v54, %v474_v4 }
 0x2da   :  { %484 = vst [vmem:[#allocation5 + $0x38] sm:$0xff] %v475_v6 }
 0x2db   :  { %497 = dma.vmem_to_hbm [thread:$0]  %s490_s15, 1024, %s492_s18, [#allocation4], %s611_s26, %s611_s26, %s612_s27  }
 0x2dc   :  { %608 = dma.done.wait [#allocation4], 1024  }
 0x2dd   :  { %609 = vsyncadd [#allocation4], 4294966272 }
 0x2de   :  { %502 = vsyncpa [#allocation3], 1 }
 0x2df   :  { %503 = vsyncpa [#allocation4], 1 }

</bundles_post_ra>
